<compile_context>
chip_gen: v6e
topology: v6e:2x2x1
jax: 0.10.0
libtpu: 0.0.40
codegen_flags: <defaults>
</compile_context>

<pallas_src>
import functools
import math

import jax
import jax.numpy as jnp
from jax import lax
from jax.experimental import pallas as pl
from jax.experimental.pallas import tpu as pltpu

_K = 10


def _lane_chunk(HW):
    # 128-lane streaming chunks when HW is lane-aligned; otherwise stream whole
    # (tc, HW) rows (avoids unaligned lane slices).
    return 128 if HW % 128 == 0 else HW


def _live_vmem_bytes(N, tc, HW, itemsize, K=_K):
    slab_native = N * tc * HW * itemsize
    slab_f32 = N * tc * HW * 4
    chunk = _lane_chunk(HW)
    keff = min(K, N * (HW // chunk))
    cand = keff * tc * chunk * 4
    aux = 2 * (3 * tc * 128 * 4) + 2 * (tc * 3 * 4)
    # 2x in + 2x out (double-buffered blocks) + ~2 f32 working slabs + candidates.
    return 4 * slab_native + 2 * slab_f32 + cand + aux


def _pick_channel_tile(N, C, HW, itemsize, budget_bytes=24 << 20, min_steps=4):
    """Largest channel tile whose live-VMEM estimate fits the budget,
    preferring >= min_steps grid steps (v7x has 2 TensorCores)."""
    if C <= 8 or C % 8 != 0:
        return C
    divisors = [t for t in range(8, C + 1, 8) if C % t == 0]
    within = [t for t in divisors if _live_vmem_bytes(N, t, HW, itemsize) <= budget_bytes]
    if not within:
        return 8
    preferred = [t for t in within if C // t >= min_steps]
    return max(preferred) if preferred else max(within)


def top10_kernel(x_ref, params_ref, out_ref, aux_ref,
                 *, K, Keff, lane_chunk, const, blend, eps):
    # x_ref: (N, tc, HW) native dtype; params_ref: (tc, 3) f32 [gamma, beta, mtopk_old]
    f32 = jnp.float32
    N, tc, HW = x_ref.shape
    n_chunks = HW // lane_chunk
    inv_count = 1.0 / (N * HW)

    # --- per-channel mean: N-axis (VPU) first, single lane (XLU) reduce last --
    xsum = jnp.sum(x_ref[...].astype(f32), axis=0)                  # (tc, HW)
    mean = jnp.sum(xsum, axis=-1, keepdims=True) * inv_count        # (tc, 1)

    # --- single streaming pass: per-(channel, lane-slot) top-Keff candidates --
    # Bubble-insert each (tc, lane_chunk) row of |x - mean| into a sorted
    # (descending) set of Keff rows.  The global per-channel top-K is contained
    # in the union of these per-lane-slot top-Keff sets.
    def insert_row(n, rows):
        dev = jnp.abs(x_ref[n].astype(f32) - mean)                  # (tc, HW)
        for c in range(n_chunks):
            v = dev if n_chunks == 1 else dev[:, c * lane_chunk:(c + 1) * lane_chunk]
            new_rows = []
            for r in rows:                                          # unrolled, Keff <= 10
                hi = jnp.maximum(r, v)
                v = jnp.minimum(r, v)
                new_rows.append(hi)
            rows = tuple(new_rows)
        return rows

    init_rows = tuple(jnp.full((tc, lane_chunk), -1.0, f32) for _ in range(Keff))
    cand_rows = lax.fori_loop(0, N, insert_row, init_rows)

    # --- exact top-K extraction on the small candidate set ---------------------
    # Masked max + duplicate counting (no index tie-break, no slab rewrites).
    zero = jnp.zeros((tc, 1), f32)

    def extract(_, carry):
        rows, s, got = carry
        m2 = rows[0]
        for r in rows[1:]:                                          # VPU combine first
            m2 = jnp.maximum(m2, r)
        m = jnp.max(m2, axis=-1, keepdims=True)                     # (tc, 1) lane reduce
        cnt = zero
        new_rows = []
        for r in rows:
            hit = r >= m
            cnt = cnt + jnp.sum(hit.astype(f32), axis=-1, keepdims=True)
            new_rows.append(jnp.where(hit, -1.0, r))
        take = jnp.minimum(cnt, jnp.maximum(float(K) - got, 0.0))
        return tuple(new_rows), s + m * take, got + take

    _, topk_sum, _ = lax.fori_loop(0, K, extract, (cand_rows, zero, zero))
    mean_topk = topk_sum * (1.0 / K)                                # (tc, 1)

    # --- buffer blend, scale, fused normalize ---------------------------------
    p = params_ref[...]                                             # (tc, 3)
    gamma, beta_p, mold = p[:, 0:1], p[:, 1:2], p[:, 2:3]
    mtopk_new = (blend * mold + (1.0 - blend) * mean_topk) * const
    scale = 1.0 / (mtopk_new + eps)

    sg = scale * gamma                                              # (tc, 1)
    out_ref[...] = ((x_ref[...].astype(f32) - mean[None]) * sg[None]
                    + beta_p[None]).astype(out_ref.dtype)

    # --- lane-dense per-channel stats (unmasked full-128-lane stores) ---------
    aux_ref[0] = jnp.broadcast_to(mean, (tc, 128))
    aux_ref[1] = jnp.broadcast_to(scale, (tc, 128))
    aux_ref[2] = jnp.broadcast_to(mtopk_new, (tc, 128))


def top10_forward(x, gamma, beta, mean_topk, running_mean, running_var,
                  momentum=0.1, K=_K, blend=0.75, eps=1e-7):
    """Training-mode forward of Top10.

    Returns (out, new_running_mean, new_running_var, new_meanTOPK_buffer).
    """
    N, C, H, W = x.shape
    HW = H * W
    L = N * HW
    assert L >= K, "Top10 requires at least K elements per channel"
    const = 0.5 * (1.0 + (math.pi * math.log(4.0)) ** 0.5) / (2.0 * math.log(L)) ** 0.5

    x3 = x.reshape(N, C, HW)                                   # free reshape, native dtype
    params = jnp.stack([gamma.astype(jnp.float32),
                        beta.astype(jnp.float32),
                        mean_topk.astype(jnp.float32)], axis=1)  # (C, 3)

    lane_chunk = _lane_chunk(HW)
    n_rows = N * (HW // lane_chunk)
    Keff = min(K, n_rows)

    itemsize = jnp.dtype(x.dtype).itemsize
    tc = _pick_channel_tile(N, C, HW, itemsize)
    grid = (C // tc,)
    live = _live_vmem_bytes(N, tc, HW, itemsize, K)
    vmem_limit = int(min(64 << 20, max(32 << 20, int(1.5 * live))))

    kernel = functools.partial(top10_kernel, K=K, Keff=Keff, lane_chunk=lane_chunk,
                               const=const, blend=blend, eps=eps)

    out3, aux = pl.pallas_call(
        kernel,
        out_shape=(
            jax.ShapeDtypeStruct((N, C, HW), x.dtype),
            jax.ShapeDtypeStruct((3, C, 128), jnp.float32),
        ),
        grid_spec=pltpu.PrefetchScalarGridSpec(
            num_scalar_prefetch=0,
            grid=grid,
            in_specs=[
                pl.BlockSpec((N, tc, HW), lambda i: (0, i, 0)),
                pl.BlockSpec((tc, 3), lambda i: (i, 0)),
            ],
            out_specs=[
                pl.BlockSpec((N, tc, HW), lambda i: (0, i, 0)),
                pl.BlockSpec((3, tc, 128), lambda i: (0, i, 0)),
            ],
        ),
        compiler_params=pltpu.CompilerParams(
            dimension_semantics=("parallel",),
            vmem_limit_bytes=vmem_limit,
        ),
    )(x3, params)

    out = out3.reshape(N, C, H, W)
    mean_c = aux[0, :, 0]
    scale_c = aux[1, :, 0]
    mtopk_new = aux[2, :, 0]

    # PyTorch: running.mul_(momentum).add_(val * (1 - momentum))
    new_rm = running_mean * momentum + mean_c * (1.0 - momentum)
    new_rv = running_var * momentum + scale_c * (1.0 - momentum)
    return out, new_rm, new_rv, mtopk_new


def top10_reference(x, gamma, beta, mean_topk_old, K=_K, blend=0.75, eps=1e-7):
    """Pure-JAX reference of the Top10 training forward for correctness."""
    N, C, H, W = x.shape
    L = N * H * W
    mean = x.reshape(N, C, -1).mean(-1).mean(0)                   # (C,)
    t = jnp.transpose(x, (1, 0, 2, 3)).reshape(C, -1)             # (C, L)
    A = jnp.abs(t - mean[:, None])
    mean_topk = jax.lax.top_k(A, K)[0].mean(-1)                   # (C,)
    const = 0.5 * (1.0 + (math.pi * math.log(4.0)) ** 0.5) / (2.0 * math.log(L)) ** 0.5
    mtopk_new = (blend * mean_topk_old + (1.0 - blend) * mean_topk) * const
    scale = 1.0 / (mtopk_new + eps)
    out = (x - mean[None, :, None, None]) * scale[None, :, None, None]
    out = out * gamma[None, :, None, None] + beta[None, :, None, None]
    return out, mean, scale, mtopk_new


if __name__ == "__main__":
    N, C, H, W = 2, 4, 16, 16
    key = jax.random.PRNGKey(0)
    kx, kg, kb, km = jax.random.split(key, 4)

    x = jax.random.normal(kx, (N, C, H, W), dtype=jnp.float32) * 2.0 + 0.5
    # Deterministic parameter/buffer init (torch.Tensor(num_features) is uninitialized).
    gamma = 1.0 + 0.1 * jax.random.normal(kg, (C,), dtype=jnp.float32)   # self.scale
    beta = 0.1 * jax.random.normal(kb, (C,), dtype=jnp.float32)          # self.mean
    mean_topk_buf = jnp.abs(0.5 * jax.random.normal(km, (C,), dtype=jnp.float32))  # meanTOPK
    running_mean = jnp.zeros((C,), jnp.float32)
    running_var = jnp.zeros((C,), jnp.float32)

    out, new_rm, new_rv, new_mtopk = top10_forward(
        x, gamma, beta, mean_topk_buf, running_mean, running_var)
    jax.block_until_ready((out, new_rm, new_rv, new_mtopk))

    ref_out, ref_mean, ref_scale, ref_mtopk = top10_reference(x, gamma, beta, mean_topk_buf)
    ref_rm = running_mean * 0.1 + ref_mean * 0.9
    ref_rv = running_var * 0.1 + ref_scale * 0.9

    assert out.shape == (N, C, H, W) and out.dtype == x.dtype
    assert jnp.allclose(out, ref_out, atol=1e-4, rtol=1e-4), "out mismatch vs reference"
    assert jnp.allclose(new_mtopk, ref_mtopk, atol=1e-5, rtol=1e-5), "meanTOPK mismatch"
    assert jnp.allclose(new_rm, ref_rm, atol=1e-5, rtol=1e-5), "running_mean mismatch"
    assert jnp.allclose(new_rv, ref_rv, atol=1e-4, rtol=1e-4), "running_var mismatch"

    print("KERNEL_OK")
</pallas_src>

<mosaic_0001>
module attributes {stable_mosaic.version = 11 : i64} {
  func.func @top10_kernel(%arg0: i32, %arg1: memref<2x4x256xf32, #tpu.memory_space<vmem>>, %arg2: memref<4x3xf32, #tpu.memory_space<vmem>>, %arg3: memref<2x4x256xf32, #tpu.memory_space<vmem>>, %arg4: memref<3x4x128xf32, #tpu.memory_space<vmem>>) attributes {dimension_semantics = [#tpu.dimension_semantics<parallel>], iteration_bounds = array<i64: 1>, scalar_prefetch = 0 : i64, scratch_operands = 0 : i64, tpu.core_type = #tpu.core_type<tc>, window_params = [{transform_indices = @transform_0, window_bounds = array<i64: 2, 4, 256>}, {transform_indices = @transform_1, window_bounds = array<i64: 4, 3>}, {transform_indices = @transform_2, window_bounds = array<i64: 2, 4, 256>}, {transform_indices = @transform_3, window_bounds = array<i64: 3, 4, 128>}]} {
    %c0 = arith.constant 0 : index
    %c0_0 = arith.constant 0 : index
    %c0_1 = arith.constant 0 : index
    %0 = vector.load %arg1[%c0, %c0_0, %c0_1] : memref<2x4x256xf32, #tpu.memory_space<vmem>>, vector<2x4x256xf32>
    %cst = arith.constant dense<0.000000e+00> : vector<4x256xf32>
    %1 = vector.multi_reduction <add>, %0, %cst [0] : vector<2x4x256xf32> to vector<4x256xf32>
    %cst_2 = arith.constant dense<0.000000e+00> : vector<4xf32>
    %2 = vector.multi_reduction <add>, %1, %cst_2 [1] : vector<4x256xf32> to vector<4xf32>
    %3 = vector.shape_cast %2 : vector<4xf32> to vector<4x1xf32>
    %cst_3 = arith.constant 0.001953125 : f32
    %4 = vector.broadcast %cst_3 : f32 to vector<4x1xf32>
    %5 = arith.mulf %3, %4 : vector<4x1xf32>
    %cst_4 = arith.constant -1.000000e+00 : f32
    %6 = vector.broadcast %cst_4 : f32 to vector<4x128xf32>
    %cst_5 = arith.constant -1.000000e+00 : f32
    %7 = vector.broadcast %cst_5 : f32 to vector<4x128xf32>
    %cst_6 = arith.constant -1.000000e+00 : f32
    %8 = vector.broadcast %cst_6 : f32 to vector<4x128xf32>
    %cst_7 = arith.constant -1.000000e+00 : f32
    %9 = vector.broadcast %cst_7 : f32 to vector<4x128xf32>
    %c0_i32 = arith.constant 0 : i32
    %c2_i32 = arith.constant 2 : i32
    %10 = arith.addi %c0_i32, %c2_i32 : i32
    %c1_i32 = arith.constant 1 : i32
    %11:4 = scf.for %arg5 = %c0_i32 to %10 step %c1_i32 iter_args(%arg6 = %6, %arg7 = %7, %arg8 = %8, %arg9 = %9) -> (vector<4x128xf32>, vector<4x128xf32>, vector<4x128xf32>, vector<4x128xf32>)  : i32 {
      %59 = arith.index_cast %arg5 : i32 to index
      %c0_33 = arith.constant 0 : index
      %c0_34 = arith.constant 0 : index
      %60 = vector.load %arg1[%59, %c0_33, %c0_34] : memref<2x4x256xf32, #tpu.memory_space<vmem>>, vector<1x4x256xf32>
      %61 = vector.shape_cast %60 : vector<1x4x256xf32> to vector<4x256xf32>
      %62 = vector.broadcast %5 : vector<4x1xf32> to vector<4x256xf32>
      %63 = arith.subf %61, %62 : vector<4x256xf32>
      %64 = math.absf %63 : vector<4x256xf32>
      %65 = vector.extract_strided_slice %64 {offsets = [0, 0], sizes = [4, 128], strides = [1, 1]} : vector<4x256xf32> to vector<4x128xf32>
      %66 = arith.maximumf %arg6, %65 : vector<4x128xf32>
      %67 = arith.minimumf %arg6, %65 : vector<4x128xf32>
      %68 = arith.maximumf %arg7, %67 : vector<4x128xf32>
      %69 = arith.minimumf %arg7, %67 : vector<4x128xf32>
      %70 = arith.maximumf %arg8, %69 : vector<4x128xf32>
      %71 = arith.minimumf %arg8, %69 : vector<4x128xf32>
      %72 = arith.maximumf %arg9, %71 : vector<4x128xf32>
      %73 = vector.extract_strided_slice %64 {offsets = [0, 128], sizes = [4, 128], strides = [1, 1]} : vector<4x256xf32> to vector<4x128xf32>
      %74 = arith.maximumf %66, %73 : vector<4x128xf32>
      %75 = arith.minimumf %66, %73 : vector<4x128xf32>
      %76 = arith.maximumf %68, %75 : vector<4x128xf32>
      %77 = arith.minimumf %68, %75 : vector<4x128xf32>
      %78 = arith.maximumf %70, %77 : vector<4x128xf32>
      %79 = arith.minimumf %70, %77 : vector<4x128xf32>
      %80 = arith.maximumf %72, %79 : vector<4x128xf32>
      scf.yield %74, %76, %78, %80 : vector<4x128xf32>, vector<4x128xf32>, vector<4x128xf32>, vector<4x128xf32>
    }
    %c2_i32_8 = arith.constant 2 : i32
    %cst_9 = arith.constant 0.000000e+00 : f32
    %12 = vector.broadcast %cst_9 : f32 to vector<4x1xf32>
    %c0_i32_10 = arith.constant 0 : i32
    %c10_i32 = arith.constant 10 : i32
    %13 = arith.addi %c0_i32_10, %c10_i32 : i32
    %c1_i32_11 = arith.constant 1 : i32
    %14:6 = scf.for %arg5 = %c0_i32_10 to %13 step %c1_i32_11 iter_args(%arg6 = %11#0, %arg7 = %11#1, %arg8 = %11#2, %arg9 = %11#3, %arg10 = %12, %arg11 = %12) -> (vector<4x128xf32>, vector<4x128xf32>, vector<4x128xf32>, vector<4x128xf32>, vector<4x1xf32>, vector<4x1xf32>)  : i32 {
      %59 = arith.maximumf %arg6, %arg7 : vector<4x128xf32>
      %60 = arith.maximumf %59, %arg8 : vector<4x128xf32>
      %61 = arith.maximumf %60, %arg9 : vector<4x128xf32>
      %cst_33 = arith.constant dense<0xFF800000> : vector<4xf32>
      %62 = vector.multi_reduction <maximumf>, %61, %cst_33 [1] : vector<4x128xf32> to vector<4xf32>
      %63 = vector.shape_cast %62 : vector<4xf32> to vector<4x1xf32>
      %64 = vector.broadcast %63 : vector<4x1xf32> to vector<4x128xf32>
      %65 = arith.cmpf oge, %arg6, %64 : vector<4x128xf32>
      %66 = arith.extui %65 : vector<4x128xi1> to vector<4x128xi32>
      %67 = arith.sitofp %66 : vector<4x128xi32> to vector<4x128xf32>
      %cst_34 = arith.constant dense<0.000000e+00> : vector<4xf32>
      %68 = vector.multi_reduction <add>, %67, %cst_34 [1] : vector<4x128xf32> to vector<4xf32>
      %69 = vector.shape_cast %68 : vector<4xf32> to vector<4x1xf32>
      %70 = arith.addf %12, %69 : vector<4x1xf32>
      %cst_35 = arith.constant -1.000000e+00 : f32
      %71 = vector.broadcast %cst_35 : f32 to vector<4x128xf32>
      %72 = arith.select %65, %71, %arg6 : vector<4x128xi1>, vector<4x128xf32>
      %73 = vector.broadcast %63 : vector<4x1xf32> to vector<4x128xf32>
      %74 = arith.cmpf oge, %arg7, %73 : vector<4x128xf32>
      %75 = arith.extui %74 : vector<4x128xi1> to vector<4x128xi32>
      %76 = arith.sitofp %75 : vector<4x128xi32> to vector<4x128xf32>
      %cst_36 = arith.constant dense<0.000000e+00> : vector<4xf32>
      %77 = vector.multi_reduction <add>, %76, %cst_36 [1] : vector<4x128xf32> to vector<4xf32>
      %78 = vector.shape_cast %77 : vector<4xf32> to vector<4x1xf32>
      %79 = arith.addf %70, %78 : vector<4x1xf32>
      %cst_37 = arith.constant -1.000000e+00 : f32
      %80 = vector.broadcast %cst_37 : f32 to vector<4x128xf32>
      %81 = arith.select %74, %80, %arg7 : vector<4x128xi1>, vector<4x128xf32>
      %82 = vector.broadcast %63 : vector<4x1xf32> to vector<4x128xf32>
      %83 = arith.cmpf oge, %arg8, %82 : vector<4x128xf32>
      %84 = arith.extui %83 : vector<4x128xi1> to vector<4x128xi32>
      %85 = arith.sitofp %84 : vector<4x128xi32> to vector<4x128xf32>
      %cst_38 = arith.constant dense<0.000000e+00> : vector<4xf32>
      %86 = vector.multi_reduction <add>, %85, %cst_38 [1] : vector<4x128xf32> to vector<4xf32>
      %87 = vector.shape_cast %86 : vector<4xf32> to vector<4x1xf32>
      %88 = arith.addf %79, %87 : vector<4x1xf32>
      %cst_39 = arith.constant -1.000000e+00 : f32
      %89 = vector.broadcast %cst_39 : f32 to vector<4x128xf32>
      %90 = arith.select %83, %89, %arg8 : vector<4x128xi1>, vector<4x128xf32>
      %91 = vector.broadcast %63 : vector<4x1xf32> to vector<4x128xf32>
      %92 = arith.cmpf oge, %arg9, %91 : vector<4x128xf32>
      %93 = arith.extui %92 : vector<4x128xi1> to vector<4x128xi32>
      %94 = arith.sitofp %93 : vector<4x128xi32> to vector<4x128xf32>
      %cst_40 = arith.constant dense<0.000000e+00> : vector<4xf32>
      %95 = vector.multi_reduction <add>, %94, %cst_40 [1] : vector<4x128xf32> to vector<4xf32>
      %96 = vector.shape_cast %95 : vector<4xf32> to vector<4x1xf32>
      %97 = arith.addf %88, %96 : vector<4x1xf32>
      %cst_41 = arith.constant -1.000000e+00 : f32
      %98 = vector.broadcast %cst_41 : f32 to vector<4x128xf32>
      %99 = arith.select %92, %98, %arg9 : vector<4x128xi1>, vector<4x128xf32>
      %cst_42 = arith.constant 1.000000e+01 : f32
      %100 = vector.broadcast %cst_42 : f32 to vector<4x1xf32>
      %101 = arith.subf %100, %arg11 : vector<4x1xf32>
      %cst_43 = arith.constant 0.000000e+00 : f32
      %102 = vector.broadcast %cst_43 : f32 to vector<4x1xf32>
      %103 = arith.maximumf %101, %102 : vector<4x1xf32>
      %104 = arith.minimumf %97, %103 : vector<4x1xf32>
      %105 = arith.mulf %63, %104 : vector<4x1xf32>
      %106 = arith.addf %arg10, %105 : vector<4x1xf32>
      %107 = arith.addf %arg11, %104 : vector<4x1xf32>
      scf.yield %72, %81, %90, %99, %106, %107 : vector<4x128xf32>, vector<4x128xf32>, vector<4x128xf32>, vector<4x128xf32>, vector<4x1xf32>, vector<4x1xf32>
    }
    %cst_12 = arith.constant 1.000000e-01 : f32
    %15 = vector.broadcast %cst_12 : f32 to vector<4x1xf32>
    %16 = arith.mulf %14#4, %15 : vector<4x1xf32>
    %c0_13 = arith.constant 0 : index
    %c0_14 = arith.constant 0 : index
    %17 = vector.load %arg2[%c0_13, %c0_14] : memref<4x3xf32, #tpu.memory_space<vmem>>, vector<4x3xf32>
    %18 = vector.extract_strided_slice %17 {offsets = [0, 0], sizes = [4, 1], strides = [1, 1]} : vector<4x3xf32> to vector<4x1xf32>
    %19 = vector.extract_strided_slice %17 {offsets = [0, 1], sizes = [4, 1], strides = [1, 1]} : vector<4x3xf32> to vector<4x1xf32>
    %20 = vector.extract_strided_slice %17 {offsets = [0, 2], sizes = [4, 1], strides = [1, 1]} : vector<4x3xf32> to vector<4x1xf32>
    %cst_15 = arith.constant 7.500000e-01 : f32
    %21 = vector.broadcast %cst_15 : f32 to vector<4x1xf32>
    %22 = arith.mulf %21, %20 : vector<4x1xf32>
    %cst_16 = arith.constant 2.500000e-01 : f32
    %23 = vector.broadcast %cst_16 : f32 to vector<4x1xf32>
    %24 = arith.mulf %23, %16 : vector<4x1xf32>
    %25 = arith.addf %22, %24 : vector<4x1xf32>
    %cst_17 = arith.constant 0.436962605 : f32
    %26 = vector.broadcast %cst_17 : f32 to vector<4x1xf32>
    %27 = arith.mulf %25, %26 : vector<4x1xf32>
    %cst_18 = arith.constant 1.000000e-07 : f32
    %28 = vector.broadcast %cst_18 : f32 to vector<4x1xf32>
    %29 = arith.addf %27, %28 : vector<4x1xf32>
    %cst_19 = arith.constant 1.000000e+00 : f32
    %30 = vector.broadcast %cst_19 : f32 to vector<4x1xf32>
    %31 = arith.divf %30, %29 : vector<4x1xf32>
    %32 = arith.mulf %31, %18 : vector<4x1xf32>
    %c0_20 = arith.constant 0 : index
    %c0_21 = arith.constant 0 : index
    %c0_22 = arith.constant 0 : index
    %33 = vector.load %arg1[%c0_20, %c0_21, %c0_22] : memref<2x4x256xf32, #tpu.memory_space<vmem>>, vector<2x4x256xf32>
    %34 = vector.shape_cast %5 : vector<4x1xf32> to vector<1x4x1xf32>
    %35 = vector.broadcast %34 : vector<1x4x1xf32> to vector<2x4x256xf32>
    %36 = arith.subf %33, %35 : vector<2x4x256xf32>
    %37 = vector.shape_cast %32 : vector<4x1xf32> to vector<1x4x1xf32>
    %38 = vector.broadcast %37 : vector<1x4x1xf32> to vector<2x4x256xf32>
    %39 = arith.mulf %36, %38 : vector<2x4x256xf32>
    %40 = vector.shape_cast %19 : vector<4x1xf32> to vector<1x4x1xf32>
    %41 = vector.broadcast %40 : vector<1x4x1xf32> to vector<2x4x256xf32>
    %42 = arith.addf %39, %41 : vector<2x4x256xf32>
    %c0_23 = arith.constant 0 : index
    %c0_24 = arith.constant 0 : index
    %c0_25 = arith.constant 0 : index
    %43 = vector.load %arg3[%c0_23, %c0_24, %c0_25] : memref<2x4x256xf32, #tpu.memory_space<vmem>>, vector<2x4x256xf32>
    tpu.vector_store %arg3[%c0_23, %c0_24, %c0_25], %42 {strides = array<i32>} : memref<2x4x256xf32, #tpu.memory_space<vmem>>, vector<2x4x256xf32>,
    %44 = vector.shape_cast %5 : vector<4x1xf32> to vector<4x1xf32>
    %45 = vector.broadcast %44 : vector<4x1xf32> to vector<4x128xf32>
    %c0_26 = arith.constant 0 : index
    %c0_27 = arith.constant 0 : index
    %c0_28 = arith.constant 0 : index
    %46 = vector.load %arg4[%c0_26, %c0_27, %c0_28] : memref<3x4x128xf32, #tpu.memory_space<vmem>>, vector<1x4x128xf32>
    %47 = vector.shape_cast %46 : vector<1x4x128xf32> to vector<4x128xf32>
    %48 = vector.shape_cast %45 : vector<4x128xf32> to vector<1x4x128xf32>
    tpu.vector_store %arg4[%c0_26, %c0_27, %c0_28], %48 {strides = array<i32>} : memref<3x4x128xf32, #tpu.memory_space<vmem>>, vector<1x4x128xf32>,
    %49 = vector.shape_cast %31 : vector<4x1xf32> to vector<4x1xf32>
    %50 = vector.broadcast %49 : vector<4x1xf32> to vector<4x128xf32>
    %c1 = arith.constant 1 : index
    %c0_29 = arith.constant 0 : index
    %c0_30 = arith.constant 0 : index
    %51 = vector.load %arg4[%c1, %c0_29, %c0_30] : memref<3x4x128xf32, #tpu.memory_space<vmem>>, vector<1x4x128xf32>
    %52 = vector.shape_cast %51 : vector<1x4x128xf32> to vector<4x128xf32>
    %53 = vector.shape_cast %50 : vector<4x128xf32> to vector<1x4x128xf32>
    tpu.vector_store %arg4[%c1, %c0_29, %c0_30], %53 {strides = array<i32>} : memref<3x4x128xf32, #tpu.memory_space<vmem>>, vector<1x4x128xf32>,
    %54 = vector.shape_cast %27 : vector<4x1xf32> to vector<4x1xf32>
    %55 = vector.broadcast %54 : vector<4x1xf32> to vector<4x128xf32>
    %c2 = arith.constant 2 : index
    %c0_31 = arith.constant 0 : index
    %c0_32 = arith.constant 0 : index
    %56 = vector.load %arg4[%c2, %c0_31, %c0_32] : memref<3x4x128xf32, #tpu.memory_space<vmem>>, vector<1x4x128xf32>
    %57 = vector.shape_cast %56 : vector<1x4x128xf32> to vector<4x128xf32>
    %58 = vector.shape_cast %55 : vector<4x128xf32> to vector<1x4x128xf32>
    tpu.vector_store %arg4[%c2, %c0_31, %c0_32], %58 {strides = array<i32>} : memref<3x4x128xf32, #tpu.memory_space<vmem>>, vector<1x4x128xf32>,
    return
  }
  func.func @transform_0(%arg0: i32) -> (i32, i32, i32) {
    %c0_i32 = arith.constant 0 : i32
    %c0_i32_0 = arith.constant 0 : i32
    %c0_i32_1 = arith.constant 0 : i32
    return %c0_i32, %arg0, %c0_i32_0 : i32, i32, i32
  }
  func.func @transform_1(%arg0: i32) -> (i32, i32) {
    %c0_i32 = arith.constant 0 : i32
    %c0_i32_0 = arith.constant 0 : i32
    return %arg0, %c0_i32 : i32, i32
  }
  func.func @transform_2(%arg0: i32) -> (i32, i32, i32) {
    %c0_i32 = arith.constant 0 : i32
    %c0_i32_0 = arith.constant 0 : i32
    %c0_i32_1 = arith.constant 0 : i32
    return %c0_i32, %arg0, %c0_i32_0 : i32, i32, i32
  }
  func.func @transform_3(%arg0: i32) -> (i32, i32, i32) {
    %c0_i32 = arith.constant 0 : i32
    %c0_i32_0 = arith.constant 0 : i32
    %c0_i32_1 = arith.constant 0 : i32
    return %c0_i32, %arg0, %c0_i32_0 : i32, i32, i32
  }
}

</mosaic_0001>

<bundles_post_ra>
// kernel: tpu_custom_call.1
= control target key start
LH: loop header
LB: loop body
LE: loop exit
PB: predicated region body
PF: predicated region fallthrough
CT: control target
= control target key end

     0   :  { %9 = vsyncpa [#allocation3], 0  ;;  %s732_s0 = inlined_call_operand.hbm [shape: f32[2,4,256], index: 0, kind: input, shape index: {}]   ;;  %s733_s1 = inlined_call_operand.hbm [shape: f32[4,3], index: 1, kind: input, shape index: {}]   ;;  %s734_s2 = inlined_call_operand.hbm [shape: f32[2,4,256], index: 2, kind: output, shape index: {0}]   ;;  %s735_s3 = inlined_call_operand.hbm [shape: f32[3,4,128], index: 3, kind: output, shape index: {1}]  }
   0x1   :  { %10 = vsyncpa [#allocation6], 0 }
   0x2   :  { %11 = vsyncpa [#allocation4], 0 }
   0x3   :  { %12 = vsyncpa [#allocation9], 0  ;;  %s612_s12 = smov [#allocation2]  }
   0x4   :  { %s18_s13 = sshll.u32 %s612_s12, 4  ;;  %s19_s13 = int_to_ptr.vmem [resolvable:$true] %s18_s13 }
   0x5   :  { %s436_s14 = scalar_lea.vmem %s19_s13, 256  ;;  %p441_p1 = scmp.lt.s32.totalorder %s19_s13, %s19_s13 }
   0x6   :  { %p437_p0 = scmp.ne.s32.totalorder %s19_s13, %s436_s14  ;;  %p442_p2 = scmp.lt.s32.totalorder %s436_s14, %s436_s14 }
   0x8   :  { %p443_p3 = por %p442_p2, %p441_p1 }
   0xa   :  { %p444_p4 = pnand %p443_p3, %p437_p0 }
   0xc   :  { %447 = shalt.err (!%p444_p4)
}
   0xd   :  { %s613_s15 = smov 128   ;;  %s614_s16 = smov 8  }
   0xe   :  { %24 = dma.hbm_to_vmem [thread:$0]  %s732_s0, 256, %s19_s13, [#allocation3], %s613_s15, %s613_s15, %s614_s16  }
   0xf   :  { %s615_s19 = smov [#allocation5]  }
  0x10   :  { %s31_s20 = sshll.u32 %s615_s19, 4  ;;  %s32_s20 = int_to_ptr.vmem [resolvable:$true] %s31_s20 }
  0x11   :  { %s456_s21 = scalar_lea.vmem %s32_s20, 64  ;;  %p461_p6 = scmp.lt.s32.totalorder %s32_s20, %s32_s20 }
  0x12   :  { %p457_p5 = scmp.ne.s32.totalorder %s32_s20, %s456_s21  ;;  %p462_p7 = scmp.lt.s32.totalorder %s456_s21, %s456_s21 }
  0x14   :  { %p463_p8 = por %p462_p7, %p461_p6 }
  0x16   :  { %p464_p9 = pnand %p463_p8, %p457_p5 }
  0x18   :  { %467 = shalt.err (!%p464_p9)
}
  0x19   :  { %34 = dma.hbm_to_vmem [thread:$0]  %s733_s1, 64, %s32_s20, [#allocation6]  }
  0x1a   :  { %556 = dma.done.wait [#allocation3], 256  }
  0x1b   :  { %557 = vsyncadd [#allocation3], 4294967040 }
  0x1c   :  { %558 = dma.done.wait [#allocation6], 64  }
  0x1d   :  { %559 = vsyncadd [#allocation6], 4294967232  ;;  %vm49_vm0 = vcmask 1043456   ;;  %v654_v0 = vld [vmem:[#allocation2] sm:$0xff]  ;;  %v656_v1 = vld [vmem:[#allocation2 + $0x8] sm:$0xff]  ;;  %v564_v15 = vmov -1.0  }
  0x1e   :  { %v45_v2 = vcombine.high %v654_v0, %v654_v0  ;;  %v46_v3 = vcombine.high %v656_v1, %v656_v1  ;;  %v50_v4 = vsel %vm49_vm0, %v654_v0, 0.0  ;;  %v51_v5 = vsel %vm49_vm0, %v656_v1, 0.0  ;;  %s672_s0 = smov 0  }
  0x1f   :  { %v52_v6 = vadd.f32 %v51_v5, %v50_v4  ;;  %v568_v16 = vmov -1.0   ;;  %v572_v17 = vmov -1.0   ;;  %v576_v18 = vmov -1.0  }
  0x20   :  { %v53_v7 = vsel %vm49_vm0, %v45_v2, 0.0  ;;  %v54_v8 = vsel %vm49_vm0, %v46_v3, 0.0 }
  0x21   :  { %v55_v9 = vadd.f32 %v54_v8, %v53_v7  ;;  %v56_v10 = vsel %vm49_vm0, %v52_v6, 0.0 }
  0x23   :  { %v57_v11 = vsel %vm49_vm0, %v55_v9, 0.0 }
  0x24   :  { %v58_v12 = vadd.f32 %v57_v11, %v56_v10 }
  0x26   :  { %59 = vadd.xlane.f32.xlu0 %v58_v12 }
  0xaf   :  { %v60_v13 = vpop.xlane.xlu0 %59 }
  0xb0   :  { %v670_v14 = vmul.f32 0.001953125, %v60_v13 }
  0xb1 LB: > { %s311_s1 = sshll.u32 %s582_s0, 3  ;;  %v80_v19 = vlaneseq  ;;  %v616_v20 = vmov 839922192   ;;  %s67_s0 = sadd.s32 1, %s582_s0   ;;  %s582_s0 = sphi %s672_s0, %s67_s0   ;;  %v578_v18 = vphi %v576_v18, %v577_v18   ;;  %v574_v17 = vphi %v572_v17, %v573_v17   ;;  %v570_v16 = vphi %v568_v16, %v569_v16   ;;  %v566_v15 = vphi %v564_v15, %v565_v15  }
  0xb2   : > { %v78_v21 = vunpack.c.l.s4 %v616_v20  ;;  %s74_s24 = scalar_lea.vmem [#allocation2], %s311_s1  ;;  %p64_p10 = scmp.ge.s32.totalorder %s67_s0, 2  }
  0xb3   : > { %v81_v22 = vshrl.u32 %v80_v19, 7  ;;  %v75_v25 = vld [vmem:[%s74_s24] sm:$0xff]  ;;  %v688_v44 = vmov (%p64_p10), 0.0   ;;  %v690_v45 = vmov (%p64_p10), 0.0   ;;  %s694_s25 = smov (%p64_p10), 0  }
  0xb4   : > { %v79_v23 = vunpack.c.0.s8 %v78_v21 }
  0xb6   : > { %v678_v24 = vsub.s32 %v79_v23, %v81_v22 }
  0xb8   : > { %v682_v26 = vrot.slane %v670_v14, %v678_v24 }
  0xba   : > { %v85_v27 = vsub.f32 %v75_v25, %v682_v26 }
  0xbc   : > { %v86_v28 = vand.u32 2147483647, %v85_v27 }
  0xbe   : > { %v87_v29 = vmax.f32 %v578_v18, %v86_v28  ;;  %v88_v30 = vmin.f32 %v578_v18, %v86_v28  ;;  %v95_v31 = vrot.slane %v86_v28, 4 }
  0xc0   : > { %v89_v32 = vmax.f32 %v574_v17, %v88_v30  ;;  %v90_v33 = vmin.f32 %v574_v17, %v88_v30  ;;  %v97_v34 = vmax.f32 %v87_v29, %v95_v31   ;;  %v98_v35 = vmin.f32 %v87_v29, %v95_v31 }
  0xc2   : > { %v91_v36 = vmax.f32 %v570_v16, %v90_v33  ;;  %v92_v37 = vmin.f32 %v570_v16, %v90_v33  ;;  %v99_v38 = vmax.f32 %v89_v32, %v98_v35   ;;  %v100_v39 = vmin.f32 %v89_v32, %v98_v35 }
  0xc3   : > { %v577_v18 = vmov %v97_v34   ;;  %v604_v48 = vmov (%p64_p10), %v97_v34  }
  0xc4   : > { %v93_v40 = vmax.f32 %v566_v15, %v92_v37  ;;  %v101_v41 = vmax.f32 %v91_v36, %v100_v39   ;;  %v102_v42 = vmin.f32 %v91_v36, %v100_v39  ;;  %v573_v17 = vmov %v99_v38   ;;  %66 = sbr.rel (!%p64_p10) target bundleno = 177 (0xb1), region = 61 }
  0xc5   :  { %v600_v47 = vmov (%p64_p10), %v99_v38  }
  0xc6   : > { %v103_v43 = vmax.f32 %v93_v40, %v102_v42   ;;  %v569_v16 = vmov %v101_v41   ;;  %v596_v46 = vmov (%p64_p10), %v101_v41  }
  0xc8   : > { %v565_v15 = vmov %v103_v43  }
  0xc9 LB: > { %v116_v49 = vmax.f32 %v606_v48, %v602_v47  ;;  %v617_v54 = vmov 0.0   ;;  %v154_v3 = vsub.f32 10.0, %v586_v44  ;;  %s109_s25 = sadd.s32 1, %s610_s25   ;;  %s610_s25 = sphi %s694_s25, %s109_s25   ;;  %v606_v48 = vphi %v604_v48, %v129_v48   ;;  %v602_v47 = vphi %v600_v47, %v137_v47   ;;  %v598_v46 = vphi %v596_v46, %v145_v46   ;;  %v594_v43 = vphi %v103_v43, %v153_v43   ;;  %v590_v45 = vphi %v690_v45, %v736_v45   ;;  %v586_v44 = vphi %v688_v44, %v159_v44  }
  0xca   : > { %p106_p11 = scmp.ge.s32.totalorder %s109_s25, 10  }
  0xcb   : > { %v117_v50 = vmax.f32 %v116_v49, %v598_v46  ;;  %v155_v7 = vmax.f32 %v154_v3, 0.0  ;;  %v161_v13 = vld [vmem:[#allocation5] sm:$0xf] (%p106_p11)  ;;  %214 = vst [vmem:[#allocation8] sm:$0xf] (%p106_p11), %v670_v14  ;;  %s618_s26 = smov (%p106_p11), 2  }
  0xcc   :  { %v162_v16 = vmul.f32 (%p106_p11), 0.75, %v161_v13  ;;  %v619_v17 = vmov (%p106_p11), 1   ;;  %v620_v19 = vmov (%p106_p11), 2   ;;  %s621_s27 = smov (%p106_p11), [#allocation8]  }
  0xcd   : > { %v118_v51 = vmax.f32 %v117_v50, %v594_v43  ;;  %424 = vset.pattern.permute.xlu1 (%p106_p11), %v619_v17  ;;  %423 = vset.pattern.permute.xlu0 (%p106_p11), %v620_v19  ;;  %s246_s28 = sshll.u32 (%p106_p11), %s621_s27, 4  ;;  %s247_s28 = int_to_ptr.vmem [resolvable:$true] %s246_s28 }
  0xce   :  { %s468_s29 = scalar_lea.vmem (%p106_p11), %s247_s28, 192  ;;  %p473_p13 = scmp.lt.s32.totalorder (%p106_p11), %s247_s28, %s247_s28 }
  0xcf   : > { %v119_v52 = vsel %vm49_vm0, %v118_v51, -inf  ;;  %p469_p12 = scmp.ne.s32.totalorder (%p106_p11), %s247_s28, %s468_s29  ;;  %p474_p0 = scmp.lt.s32.totalorder (%p106_p11), %s468_s29, %s468_s29 }
  0xd0   : > { %120 = vmax.xlane.f32.xlu0 %v119_v52 }
  0xd1   :  { %p475_p1 = por (%p106_p11), %p474_p0, %p473_p13 }
  0xd3   :  { %p476_p2 = pnand (%p106_p11), %p475_p1, %p469_p12 }
 0x159   : > { %v121_v53 = vpop.xlane.xlu0 %120 }
 0x15a   : > { %vm130_vm1 = vcmp.ge.f32.partialorder %v602_v47, %v121_v53  ;;  %vm122_vm2 = vcmp.ge.f32.partialorder %v606_v48, %v121_v53  ;;  %vm138_vm3 = vcmp.ge.f32.partialorder %v598_v46, %v121_v53  ;;  %vm146_vm4 = vcmp.ge.f32.partialorder %v594_v43, %v121_v53 }
 0x15b   : > { %v308_v55 = vsel %vm130_vm1, 1.0, %v617_v54  ;;  %v137_v47 = vsel %vm130_vm1, -1.0, %v602_v47   ;;  %v307_v56 = vsel %vm122_vm2, 1.0, %v617_v54  ;;  %v129_v48 = vsel %vm122_vm2, -1.0, %v606_v48  }
 0x15c   : > { %v133_v57 = vsel %vm49_vm0, %v308_v55, 0.0  ;;  %v125_v58 = vsel %vm49_vm0, %v307_v56, 0.0  ;;  %v145_v46 = vsel %vm138_vm3, -1.0, %v598_v46   ;;  %v309_v59 = vsel %vm138_vm3, 1.0, %v617_v54 }
 0x15d   : > { %134 = vadd.xlane.f32.xlu1 %v133_v57  ;;  %126 = vadd.xlane.f32.xlu0 %v125_v58  ;;  %v310_v60 = vsel %vm146_vm4, 1.0, %v617_v54  ;;  %v153_v43 = vsel %vm146_vm4, -1.0, %v594_v43   ;;  %v141_v61 = vsel %vm49_vm0, %v309_v59, 0.0 }
 0x15e   : > { %v149_v62 = vsel %vm49_vm0, %v310_v60, 0.0 }
 0x161   : > { %142 = vadd.xlane.f32.xlu1 %v141_v61  ;;  %150 = vadd.xlane.f32.xlu0 %v149_v62 }
 0x172   :  { %200 = vperm.xlu1 (%p106_p11), %424, %v161_v13  }
 0x176   :  { %425 = vset.pattern.permute.xlu1 (%p106_p11), %v620_v19 }
 0x177   :  { %170 = vrot.lane.b32.xlu0 (%p106_p11), %v161_v13, %s618_s26 }
 0x1e6   : > { %v135_v63 = vpop.xlane.xlu1 %134  ;;  %v127_v2 = vpop.xlane.xlu0 %126 }
 0x1e7   : > { %v136_v4 = vadd.f32 %v135_v63, %v127_v2 }
 0x1ea   : > { %v143_v5 = vpop.xlane.xlu1 %142  ;;  %v151_v8 = vpop.xlane.xlu0 %150 }
 0x1eb   : > { %v144_v6 = vadd.f32 %v143_v5, %v136_v4 }
 0x1ed   : > { %v152_v9 = vadd.f32 %v151_v8, %v144_v6 }
 0x1ee   :  { %v171_v25 = vpop.permute.xlu0 (%p106_p11), %170  ;;  %v201_v14 = vpop.permute.xlu1 (%p106_p11), %200 }
 0x1ef   : > { %v156_v10 = vmin.f32 %v152_v9, %v155_v7 }
 0x1f1   : > { %v157_v11 = vmul.f32 %v156_v10, %v121_v53  ;;  %v159_v44 = vadd.f32 %v586_v44, %v156_v10   ;;  %108 = sbr.rel (!%p106_p11) target bundleno = 201 (0xc9), region = 72 }
 0x1f3   : > { %v158_v12 = vadd.f32 %v590_v45, %v157_v11  }
 0x1f5   : > { %v736_v45 = vmov %v158_v12  ;;  %v160_v15 = vmul.f32 (%p106_p11), 0.1, %v158_v12 }
 0x1f7   :  { %v163_v18 = vmul.f32 0.25, %v160_v15 }
 0x1f9   :  { %v164_v20 = vadd.f32 %v163_v18, %v162_v16 }
 0x1fb   :  { %v165_v21 = vmul.f32 0.4369626, %v164_v20 }
 0x1fd   :  { %v166_v22 = vadd.f32 1e-07, %v165_v21 }
 0x1ff   :  { %426 = vrcp.f32 %v166_v22 }
 0x20c   :  { %v427_v23 = vpop.eup %426 }
 0x20d   :  { %217 = vperm.xlu1 %425, %v427_v23   ;;  %v173_v27 = vmul.f32 %v427_v23, %v171_v25 }
 0x20f   :  { %187 = vperm.xlu0 %423, %v173_v27  }
 0x211   :  { %224 = vperm.xlu1 %425, %v165_v21  }
 0x288   :  { %v218_v28 = vpop.permute.xlu1 %217 }
 0x289   :  { %221 = vst [vmem:[#allocation8 + $0x4] sm:$0xf] %v218_v28 }
 0x28c   :  { %v225_v29 = vpop.permute.xlu1 %224 }
 0x28d   :  { %228 = vst [vmem:[#allocation8 + $0x8] sm:$0xf] %v225_v29 }
 0x28e   :  { %479 = shalt.err (!%p476_p2)
}
 0x28f   :  { %s622_s30 = smov 64   ;;  %s623_s4 = smov 4   ;;  %v183_v30 = vsub.f32 %v654_v0, %v682_v26  ;;  %v184_v31 = vsub.f32 %v656_v1, %v682_v26  ;;  %v188_v32 = vpop.permute.xlu0 %187  ;;  %v208_v34 = vrot.slane %v201_v14, %v678_v24 }
 0x290   :  { %252 = dma.vmem_to_hbm [thread:$0]  %s247_s28, 192, %s735_s3, [#allocation9], %s622_s30, %s622_s30, %s623_s4   ;;  %v195_v33 = vrot.slane %v188_v32, %v678_v24 }
 0x291   :  { %s624_s7 = smov [#allocation7]  }
 0x292   :  { %s234_s8 = sshll.u32 %s624_s7, 4  ;;  %v197_v35 = vmul.f32 %v195_v33, %v183_v30  ;;  %v198_v36 = vmul.f32 %v195_v33, %v184_v31  ;;  %s235_s8 = int_to_ptr.vmem [resolvable:$true] %s234_s8 }
 0x293   :  { %s488_s3 = scalar_lea.vmem %s235_s8, 256  ;;  %p493_p4 = scmp.lt.s32.totalorder %s235_s8, %s235_s8 }
 0x294   :  { %v210_v37 = vadd.f32 %v208_v34, %v197_v35  ;;  %v211_v38 = vadd.f32 %v208_v34, %v198_v36  ;;  %p489_p3 = scmp.ne.s32.totalorder %s235_s8, %s488_s3  ;;  %p494_p5 = scmp.lt.s32.totalorder %s488_s3, %s488_s3 }
 0x296   :  { %212 = vst [vmem:[#allocation7] sm:$0xff] %v210_v37  ;;  %213 = vst [vmem:[#allocation7 + $0x8] sm:$0xff] %v211_v38  ;;  %p495_p6 = por %p494_p5, %p493_p4 }
 0x298   :  { %p496_p7 = pnand %p495_p6, %p489_p3 }
 0x29a   :  { %499 = shalt.err (!%p496_p7)
}
 0x29b   :  { %240 = dma.vmem_to_hbm [thread:$0]  %s235_s8, 256, %s734_s2, [#allocation4], %s613_s15, %s613_s15, %s614_s16  }
 0x29c   :  { %560 = dma.done.wait [#allocation4], 256  }
 0x29d   :  { %561 = vsyncadd [#allocation4], 4294967040 }
 0x29e   :  { %562 = dma.done.wait [#allocation9], 192  }
 0x29f   :  { %563 = vsyncadd [#allocation9], 4294967104 }
 0x2a0   :  { %259 = vsyncpa [#allocation3], 1 }
 0x2a1   :  { %260 = vsyncpa [#allocation6], 1 }
 0x2a2   :  { %261 = vsyncpa [#allocation4], 1 }
 0x2a3   :  { %262 = vsyncpa [#allocation9], 1 }

</bundles_post_ra>
